<compile_context>
chip_gen: v7x
topology: tpu7x:2x2x1
jax: 0.10.0
libtpu: 0.0.40
codegen_flags: <defaults>
</compile_context>

<pallas_src>
import jax
import jax.numpy as jnp
from jax import lax
from jax.experimental import pallas as pl
from jax.experimental.pallas import tpu as pltpu

# ----- small, deterministic problem sizes (original: hidden=128, input=2) -----
TIME_STEPS = 8       # encoder sequence length
PREDICT_STEPS = 4    # decoder sequence length
HIDDEN = 32
INPUT_SIZE = 2
BATCH = 2

LANES = 128          # hidden dim is zero-padded to a full vreg lane width
CHUNK = 4            # encoder projection chunk size (2 chunks of 4 timesteps)
assert TIME_STEPS % CHUNK == 0

RECURRENT_MAX = 2.0 ** (1.0 / TIME_STEPS)      # encoder hidden_max_abs
DECODER_MAX = 2.0 ** (1.0 / PREDICT_STEPS)     # decoder hidden_max_abs


def net_kernel(x_ref, vecs_ref, mats_ref, out_ref):
    f32, bf16 = jnp.float32, jnp.bfloat16
    T, P, CH, L = TIME_STEPS, PREDICT_STEPS, CHUNK, LANES

    # ---- unpack the packed slabs (static slices of a single DMA each) ----
    # All rows are lane-padded to 128 with zeros above H, so lanes >= H stay
    # exactly zero through every projection / recurrence below.
    w0e0 = vecs_ref[0:1, :]
    w0e1 = vecs_ref[1:2, :]
    b0e = vecs_ref[2:3, :]
    u0e = jnp.clip(vecs_ref[3:4, :], -RECURRENT_MAX, RECURRENT_MAX)
    u1e = jnp.clip(vecs_ref[5:6, :], -RECURRENT_MAX, RECURRENT_MAX)
    # clip + broadcast once, hoisted out of the unrolled loops
    # (JAX does not CSE broadcast_in_dim).
    b1e_c = jnp.broadcast_to(vecs_ref[4:5, :], (CH, L))
    b0d_c = jnp.broadcast_to(vecs_ref[6:7, :], (CH, L))
    u0d_b = jnp.broadcast_to(
        jnp.clip(vecs_ref[7:8, :], -DECODER_MAX, DECODER_MAX), (T, L))
    b1d_b = jnp.broadcast_to(vecs_ref[8:9, :], (T, L))
    u1d_b = jnp.broadcast_to(
        jnp.clip(vecs_ref[9:10, :], -DECODER_MAX, DECODER_MAX), (T, L))
    bo_b = jnp.broadcast_to(vecs_ref[10:11, :], (T, L))

    # ---- encoder layer 0: Din == 2 input projection on the VPU ----
    # Only batch row B-1 is carried: y[:, -1] (last batch element under the
    # module's seq-major layout) is the only encoder output used downstream,
    # and IndRNN never mixes batch rows.
    x = x_ref[...]                                         # (T, 2)
    proj0 = x[:, 0:1] * w0e0 + x[:, 1:2] * w0e1 + b0e      # (T, L)

    # ---- encoder layer-0 recurrence + chunked layer-1 projection (MXU) ----
    # Each chunk's dot depends only on its CH recurrence steps, so MXU work for
    # chunk c can overlap the VALU recurrence of chunk c+1.
    h0 = jnp.zeros((1, L), f32)
    proj1_chunks = []
    for c in range(T // CH):                               # static unroll
        rows = []
        for t in range(c * CH, (c + 1) * CH):
            h0 = jnp.maximum(proj0[t:t + 1, :] + u0e * h0, 0.0)
            rows.append(h0)
        lhs = jnp.concatenate(rows, axis=0).astype(bf16)   # (CH, L) bf16
        proj1_chunks.append(
            jnp.dot(lhs, mats_ref[0:L, :], preferred_element_type=f32) + b1e_c)

    # ---- encoder layer-1 recurrence + chunked decoder layer-0 projection ----
    # (the decoder input is y[:, -1] expanded over PREDICT_STEPS, so its input
    #  projection is shared by every decoder step and computed exactly once)
    h1 = jnp.zeros((1, L), f32)
    pd0_chunks = []
    for c in range(T // CH):                               # static unroll
        pr = proj1_chunks[c]
        rows = []
        for i in range(CH):
            h1 = jnp.maximum(pr[i:i + 1, :] + u1e * h1, 0.0)
            rows.append(h1)
        lhs = jnp.concatenate(rows, axis=0).astype(bf16)
        pd0_chunks.append(
            jnp.dot(lhs, mats_ref[L:2 * L, :], preferred_element_type=f32) + b0d_c)
    proj_d0 = jnp.concatenate(pd0_chunks, axis=0)          # (T, L)

    # ---- decoder: layer-0 step, layer-1 projection+step, output head ----
    # All three dots of step s are issued as soon as their LHS retires, so the
    # MXU work of step s overlaps the VALU recurrence of step s+1.
    hd0 = jnp.zeros((T, L), f32)
    hd1 = jnp.zeros((T, L), f32)
    for s in range(P):                                     # static unroll (P = 4)
        hd0 = jnp.maximum(proj_d0 + u0d_b * hd0, 0.0)
        pd1 = jnp.dot(hd0.astype(bf16), mats_ref[2 * L:3 * L, :],
                      preferred_element_type=f32) + b1d_b
        hd1 = jnp.maximum(pd1 + u1d_b * hd1, 0.0)
        # lane-dense (T, 128) aligned output rows; wrapper slices [:, :2]
        out_ref[s * T:(s + 1) * T, :] = (
            jnp.dot(hd1.astype(bf16), mats_ref[3 * L:4 * L, :],
                    preferred_element_type=f32) + bo_b)


# ---------------------- parameter packing (done once) ----------------------
def pack_params(p):
    """Pack all parameters into two lane-padded slabs (one DMA each)."""
    def row(v):
        v = jnp.asarray(v, jnp.float32).reshape(-1)
        return jnp.zeros((1, LANES), jnp.float32).at[0, :v.shape[0]].set(v)

    vec_rows = [
        row(p["w0e"][0]), row(p["w0e"][1]),     # rows 0,1: input-proj rows
        row(p["b0e"]), row(p["u0e"]),           # rows 2,3
        row(p["b1e"]), row(p["u1e"]),           # rows 4,5
        row(p["b0d"]), row(p["u0d"]),           # rows 6,7
        row(p["b1d"]), row(p["u1d"]),           # rows 8,9
        row(p["bo"]),                           # row 10 (lanes 0:2)
    ]
    pad = jnp.zeros((16 - len(vec_rows), LANES), jnp.float32)
    vecs = jnp.concatenate(vec_rows + [pad], axis=0)        # (16, 128) f32

    def mat(w):                                 # (din, dout) -> (128,128) bf16
        m = jnp.zeros((LANES, LANES), jnp.float32)
        m = m.at[:w.shape[0], :w.shape[1]].set(w)
        return m.astype(jnp.bfloat16)

    mats = jnp.concatenate(
        [mat(p["w1e"]), mat(p["w0d"]), mat(p["w1d"]), mat(p["wo"])], axis=0)
    return {"vecs": vecs, "mats": mats}                     # (512, 128) bf16


def net_forward(x, packed):
    T, B, _ = x.shape
    P = PREDICT_STEPS
    # Only batch row B-1 feeds y[:, -1]; IndRNN has no cross-batch mixing, so
    # the other encoder batch rows are dead code for the module's output.
    x_last = x[:, B - 1, :]                                 # (T, Din)

    vmem = lambda: pl.BlockSpec(memory_space=pltpu.MemorySpace.VMEM)
    out_pad = pl.pallas_call(
        net_kernel,
        out_shape=jax.ShapeDtypeStruct((P * T, LANES), jnp.float32),
        in_specs=[vmem(), vmem(), vmem()],
        out_specs=vmem(),
    )(x_last, packed["vecs"], packed["mats"])
    # TODO(synk): at production sizes (hidden=128, many trajectories per call)
    # add a leading batch grid axis with dimension_semantics=("parallel",) for
    # v7x's second TensorCore, give the weight slabs a constant-index
    # BlockSpec so they stay VMEM-resident across grid steps, and budget the
    # working set against v7x's 64 MiB/TC via CompilerParams(vmem_limit_bytes).
    # At the toy sizes here a grid is pure per-step overhead, so grid=() is
    # intentional; real throughput wins come from batching many independent
    # trajectories per call to fill sublanes/lanes.
    return out_pad[:, :2].reshape(P, T, 2)


# ---------------------- deterministic parameter init ----------------------
def init_params(key):
    ks = jax.random.split(key, 14)

    def w(k, din, dout, scale=0.1):
        return jax.random.normal(k, (din, dout), jnp.float32) * scale

    def u(k, max_abs):
        return jax.random.uniform(k, (1, HIDDEN), jnp.float32, -max_abs, max_abs)

    def b(k):
        return jax.random.normal(k, (1, HIDDEN), jnp.float32) * 0.01

    p = {
        # encoder layer 0 / 1
        "w0e": w(ks[0], INPUT_SIZE, HIDDEN), "b0e": b(ks[1]), "u0e": u(ks[2], RECURRENT_MAX),
        "w1e": w(ks[3], HIDDEN, HIDDEN),     "b1e": b(ks[4]), "u1e": u(ks[5], RECURRENT_MAX),
        # decoder layer 0 / 1
        "w0d": w(ks[6], HIDDEN, HIDDEN),     "b0d": b(ks[7]), "u0d": u(ks[8], DECODER_MAX),
        "w1d": w(ks[9], HIDDEN, HIDDEN),     "b1d": b(ks[10]), "u1d": u(ks[11], DECODER_MAX),
        # output Linear(hidden, 2), stored transposed as (H, 2)
        "wo": w(ks[12], HIDDEN, 2),
        "bo": jax.random.normal(ks[13], (1, 2), jnp.float32) * 0.01,
    }
    return p


# ---------------------- pure-JAX reference (for checking) ----------------------
def _indrnn_ref(x_seq, layers, max_abs):
    h_seq = x_seq
    for (wgt, bias, u_rec) in layers:
        u_c = jnp.clip(u_rec, -max_abs, max_abs)
        proj = jnp.einsum("tbd,dh->tbh", h_seq, wgt) + bias

        def step(h, pr):
            h_new = jnp.maximum(pr + u_c * h, 0.0)
            return h_new, h_new

        _, h_seq = lax.scan(step, jnp.zeros((h_seq.shape[1], wgt.shape[1]), jnp.float32), proj)
    return h_seq


def net_ref(x, p):
    enc = _indrnn_ref(x, [(p["w0e"], p["b0e"], p["u0e"]),
                          (p["w1e"], p["b1e"], p["u1e"])], RECURRENT_MAX)
    # NOTE: with seq-major (T, B, H) this is the LAST BATCH element, exactly as
    # the original PyTorch module computes it.
    last = enc[:, -1, :]                                            # (T, H)
    temp = jnp.broadcast_to(last, (PREDICT_STEPS,) + last.shape)    # (P, T, H)
    dec = _indrnn_ref(temp, [(p["w0d"], p["b0d"], p["u0d"]),
                             (p["w1d"], p["b1d"], p["u1d"])], DECODER_MAX)
    return jnp.einsum("pth,ho->pto", dec, p["wo"]) + p["bo"]


if __name__ == "__main__":
    key = jax.random.PRNGKey(0)
    kx, kp = jax.random.split(key)
    params = init_params(kp)
    packed = pack_params(params)          # built once; amortized over calls
    x = jax.random.normal(kx, (TIME_STEPS, BATCH, INPUT_SIZE), jnp.float32)

    out = net_forward(x, packed)
    out = jax.block_until_ready(out)

    assert out.shape == (PREDICT_STEPS, TIME_STEPS, 2), out.shape
    ref = net_ref(x, params)
    # kernel uses bf16 MXU operands (f32 recurrence / accumulation); the
    # reference is pure f32, so allow a slightly looser tolerance.
    if not jnp.allclose(out, ref, rtol=2e-2, atol=2e-2):
        raise AssertionError("Pallas kernel does not match JAX reference")

    print("KERNEL_OK")
</pallas_src>

<mosaic_0001>
module attributes {stable_mosaic.version = 11 : i64} {
  func.func @net_kernel(%arg0: memref<8x2xf32, #tpu.memory_space<vmem>>, %arg1: memref<16x128xf32, #tpu.memory_space<vmem>>, %arg2: memref<512x128xbf16, #tpu.memory_space<vmem>>, %arg3: memref<32x128xf32, #tpu.memory_space<vmem>>) attributes {dimension_semantics = [], scalar_prefetch = 0 : i64, scratch_operands = 0 : i64, tpu.core_type = #tpu.core_type<tc>} {
    %c0 = arith.constant 0 : index
    %c0_0 = arith.constant 0 : index
    %0 = vector.load %arg1[%c0, %c0_0] : memref<16x128xf32, #tpu.memory_space<vmem>>, vector<1x128xf32>
    %c1 = arith.constant 1 : index
    %c0_1 = arith.constant 0 : index
    %1 = vector.load %arg1[%c1, %c0_1] : memref<16x128xf32, #tpu.memory_space<vmem>>, vector<1x128xf32>
    %c2 = arith.constant 2 : index
    %c0_2 = arith.constant 0 : index
    %2 = vector.load %arg1[%c2, %c0_2] : memref<16x128xf32, #tpu.memory_space<vmem>>, vector<1x128xf32>
    %c3 = arith.constant 3 : index
    %c0_3 = arith.constant 0 : index
    %3 = vector.load %arg1[%c3, %c0_3] : memref<16x128xf32, #tpu.memory_space<vmem>>, vector<1x128xf32>
    %cst = arith.constant -1.09050775 : f32
    %cst_4 = arith.constant 1.09050775 : f32
    %4 = vector.broadcast %cst : f32 to vector<1x128xf32>
    %5 = arith.maximumf %4, %3 : vector<1x128xf32>
    %6 = vector.broadcast %cst_4 : f32 to vector<1x128xf32>
    %7 = arith.minimumf %6, %5 : vector<1x128xf32>
    %c5 = arith.constant 5 : index
    %c0_5 = arith.constant 0 : index
    %8 = vector.load %arg1[%c5, %c0_5] : memref<16x128xf32, #tpu.memory_space<vmem>>, vector<1x128xf32>
    %cst_6 = arith.constant -1.09050775 : f32
    %cst_7 = arith.constant 1.09050775 : f32
    %9 = vector.broadcast %cst_6 : f32 to vector<1x128xf32>
    %10 = arith.maximumf %9, %8 : vector<1x128xf32>
    %11 = vector.broadcast %cst_7 : f32 to vector<1x128xf32>
    %12 = arith.minimumf %11, %10 : vector<1x128xf32>
    %c4 = arith.constant 4 : index
    %c0_8 = arith.constant 0 : index
    %13 = vector.load %arg1[%c4, %c0_8] : memref<16x128xf32, #tpu.memory_space<vmem>>, vector<1x128xf32>
    %14 = vector.shape_cast %13 : vector<1x128xf32> to vector<1x128xf32>
    %15 = vector.broadcast %14 : vector<1x128xf32> to vector<4x128xf32>
    %c6 = arith.constant 6 : index
    %c0_9 = arith.constant 0 : index
    %16 = vector.load %arg1[%c6, %c0_9] : memref<16x128xf32, #tpu.memory_space<vmem>>, vector<1x128xf32>
    %17 = vector.shape_cast %16 : vector<1x128xf32> to vector<1x128xf32>
    %18 = vector.broadcast %17 : vector<1x128xf32> to vector<4x128xf32>
    %c7 = arith.constant 7 : index
    %c0_10 = arith.constant 0 : index
    %19 = vector.load %arg1[%c7, %c0_10] : memref<16x128xf32, #tpu.memory_space<vmem>>, vector<1x128xf32>
    %cst_11 = arith.constant -1.18920708 : f32
    %cst_12 = arith.constant 1.18920708 : f32
    %20 = vector.broadcast %cst_11 : f32 to vector<1x128xf32>
    %21 = arith.maximumf %20, %19 : vector<1x128xf32>
    %22 = vector.broadcast %cst_12 : f32 to vector<1x128xf32>
    %23 = arith.minimumf %22, %21 : vector<1x128xf32>
    %24 = vector.shape_cast %23 : vector<1x128xf32> to vector<1x128xf32>
    %25 = vector.broadcast %24 : vector<1x128xf32> to vector<8x128xf32>
    %c8 = arith.constant 8 : index
    %c0_13 = arith.constant 0 : index
    %26 = vector.load %arg1[%c8, %c0_13] : memref<16x128xf32, #tpu.memory_space<vmem>>, vector<1x128xf32>
    %27 = vector.shape_cast %26 : vector<1x128xf32> to vector<1x128xf32>
    %28 = vector.broadcast %27 : vector<1x128xf32> to vector<8x128xf32>
    %c9 = arith.constant 9 : index
    %c0_14 = arith.constant 0 : index
    %29 = vector.load %arg1[%c9, %c0_14] : memref<16x128xf32, #tpu.memory_space<vmem>>, vector<1x128xf32>
    %cst_15 = arith.constant -1.18920708 : f32
    %cst_16 = arith.constant 1.18920708 : f32
    %30 = vector.broadcast %cst_15 : f32 to vector<1x128xf32>
    %31 = arith.maximumf %30, %29 : vector<1x128xf32>
    %32 = vector.broadcast %cst_16 : f32 to vector<1x128xf32>
    %33 = arith.minimumf %32, %31 : vector<1x128xf32>
    %34 = vector.shape_cast %33 : vector<1x128xf32> to vector<1x128xf32>
    %35 = vector.broadcast %34 : vector<1x128xf32> to vector<8x128xf32>
    %c10 = arith.constant 10 : index
    %c0_17 = arith.constant 0 : index
    %36 = vector.load %arg1[%c10, %c0_17] : memref<16x128xf32, #tpu.memory_space<vmem>>, vector<1x128xf32>
    %37 = vector.shape_cast %36 : vector<1x128xf32> to vector<1x128xf32>
    %38 = vector.broadcast %37 : vector<1x128xf32> to vector<8x128xf32>
    %c0_18 = arith.constant 0 : index
    %c0_19 = arith.constant 0 : index
    %39 = vector.load %arg0[%c0_18, %c0_19] : memref<8x2xf32, #tpu.memory_space<vmem>>, vector<8x2xf32>
    %40 = vector.extract_strided_slice %39 {offsets = [0, 0], sizes = [8, 1], strides = [1, 1]} : vector<8x2xf32> to vector<8x1xf32>
    %41 = vector.broadcast %40 : vector<8x1xf32> to vector<8x128xf32>
    %42 = vector.broadcast %0 : vector<1x128xf32> to vector<8x128xf32>
    %43 = arith.mulf %41, %42 : vector<8x128xf32>
    %44 = vector.extract_strided_slice %39 {offsets = [0, 1], sizes = [8, 1], strides = [1, 1]} : vector<8x2xf32> to vector<8x1xf32>
    %45 = vector.broadcast %44 : vector<8x1xf32> to vector<8x128xf32>
    %46 = vector.broadcast %1 : vector<1x128xf32> to vector<8x128xf32>
    %47 = arith.mulf %45, %46 : vector<8x128xf32>
    %48 = arith.addf %43, %47 : vector<8x128xf32>
    %49 = vector.broadcast %2 : vector<1x128xf32> to vector<8x128xf32>
    %50 = arith.addf %48, %49 : vector<8x128xf32>
    %cst_20 = arith.constant 0.000000e+00 : f32
    %51 = vector.broadcast %cst_20 : f32 to vector<1x128xf32>
    %52 = vector.extract_strided_slice %50 {offsets = [0, 0], sizes = [1, 128], strides = [1, 1]} : vector<8x128xf32> to vector<1x128xf32>
    %53 = arith.mulf %7, %51 : vector<1x128xf32>
    %54 = arith.addf %52, %53 : vector<1x128xf32>
    %cst_21 = arith.constant 0.000000e+00 : f32
    %55 = vector.broadcast %cst_21 : f32 to vector<1x128xf32>
    %56 = arith.maximumf %54, %55 : vector<1x128xf32>
    %57 = vector.extract_strided_slice %50 {offsets = [1, 0], sizes = [1, 128], strides = [1, 1]} : vector<8x128xf32> to vector<1x128xf32>
    %58 = arith.mulf %7, %56 : vector<1x128xf32>
    %59 = arith.addf %57, %58 : vector<1x128xf32>
    %cst_22 = arith.constant 0.000000e+00 : f32
    %60 = vector.broadcast %cst_22 : f32 to vector<1x128xf32>
    %61 = arith.maximumf %59, %60 : vector<1x128xf32>
    %62 = vector.extract_strided_slice %50 {offsets = [2, 0], sizes = [1, 128], strides = [1, 1]} : vector<8x128xf32> to vector<1x128xf32>
    %63 = arith.mulf %7, %61 : vector<1x128xf32>
    %64 = arith.addf %62, %63 : vector<1x128xf32>
    %cst_23 = arith.constant 0.000000e+00 : f32
    %65 = vector.broadcast %cst_23 : f32 to vector<1x128xf32>
    %66 = arith.maximumf %64, %65 : vector<1x128xf32>
    %67 = vector.extract_strided_slice %50 {offsets = [3, 0], sizes = [1, 128], strides = [1, 1]} : vector<8x128xf32> to vector<1x128xf32>
    %68 = arith.mulf %7, %66 : vector<1x128xf32>
    %69 = arith.addf %67, %68 : vector<1x128xf32>
    %cst_24 = arith.constant 0.000000e+00 : f32
    %70 = vector.broadcast %cst_24 : f32 to vector<1x128xf32>
    %71 = arith.maximumf %69, %70 : vector<1x128xf32>
    %72 = tpu.concatenate %56, %61, %66, %71 in 0 : vector<1x128xf32>, vector<1x128xf32>, vector<1x128xf32>, vector<1x128xf32> -> vector<4x128xf32>
    %73 = arith.truncf %72 : vector<4x128xf32> to vector<4x128xbf16>
    %c0_25 = arith.constant 0 : index
    %c0_26 = arith.constant 0 : index
    %74 = vector.load %arg2[%c0_25, %c0_26] : memref<512x128xbf16, #tpu.memory_space<vmem>>, vector<128x128xbf16>
    %cst_27 = arith.constant dense<0.000000e+00> : vector<4x128xf32>
    %75 = tpu.matmul %73, %74, %cst_27 {dimension_numbers = #tpu.dot_dimension_numbers<[1], [0], [0], [1], [0, 0, 1, 1], [], []>} : vector<4x128xbf16>, vector<128x128xbf16>, vector<4x128xf32> -> vector<4x128xf32>
    %76 = arith.addf %75, %15 : vector<4x128xf32>
    %77 = vector.extract_strided_slice %50 {offsets = [4, 0], sizes = [1, 128], strides = [1, 1]} : vector<8x128xf32> to vector<1x128xf32>
    %78 = arith.mulf %7, %71 : vector<1x128xf32>
    %79 = arith.addf %77, %78 : vector<1x128xf32>
    %cst_28 = arith.constant 0.000000e+00 : f32
    %80 = vector.broadcast %cst_28 : f32 to vector<1x128xf32>
    %81 = arith.maximumf %79, %80 : vector<1x128xf32>
    %82 = vector.extract_strided_slice %50 {offsets = [5, 0], sizes = [1, 128], strides = [1, 1]} : vector<8x128xf32> to vector<1x128xf32>
    %83 = arith.mulf %7, %81 : vector<1x128xf32>
    %84 = arith.addf %82, %83 : vector<1x128xf32>
    %cst_29 = arith.constant 0.000000e+00 : f32
    %85 = vector.broadcast %cst_29 : f32 to vector<1x128xf32>
    %86 = arith.maximumf %84, %85 : vector<1x128xf32>
    %87 = vector.extract_strided_slice %50 {offsets = [6, 0], sizes = [1, 128], strides = [1, 1]} : vector<8x128xf32> to vector<1x128xf32>
    %88 = arith.mulf %7, %86 : vector<1x128xf32>
    %89 = arith.addf %87, %88 : vector<1x128xf32>
    %cst_30 = arith.constant 0.000000e+00 : f32
    %90 = vector.broadcast %cst_30 : f32 to vector<1x128xf32>
    %91 = arith.maximumf %89, %90 : vector<1x128xf32>
    %92 = vector.extract_strided_slice %50 {offsets = [7, 0], sizes = [1, 128], strides = [1, 1]} : vector<8x128xf32> to vector<1x128xf32>
    %93 = arith.mulf %7, %91 : vector<1x128xf32>
    %94 = arith.addf %92, %93 : vector<1x128xf32>
    %cst_31 = arith.constant 0.000000e+00 : f32
    %95 = vector.broadcast %cst_31 : f32 to vector<1x128xf32>
    %96 = arith.maximumf %94, %95 : vector<1x128xf32>
    %97 = tpu.concatenate %81, %86, %91, %96 in 0 : vector<1x128xf32>, vector<1x128xf32>, vector<1x128xf32>, vector<1x128xf32> -> vector<4x128xf32>
    %98 = arith.truncf %97 : vector<4x128xf32> to vector<4x128xbf16>
    %c0_32 = arith.constant 0 : index
    %c0_33 = arith.constant 0 : index
    %99 = vector.load %arg2[%c0_32, %c0_33] : memref<512x128xbf16, #tpu.memory_space<vmem>>, vector<128x128xbf16>
    %cst_34 = arith.constant dense<0.000000e+00> : vector<4x128xf32>
    %100 = tpu.matmul %98, %99, %cst_34 {dimension_numbers = #tpu.dot_dimension_numbers<[1], [0], [0], [1], [0, 0, 1, 1], [], []>} : vector<4x128xbf16>, vector<128x128xbf16>, vector<4x128xf32> -> vector<4x128xf32>
    %101 = arith.addf %100, %15 : vector<4x128xf32>
    %cst_35 = arith.constant 0.000000e+00 : f32
    %102 = vector.broadcast %cst_35 : f32 to vector<1x128xf32>
    %103 = vector.extract_strided_slice %76 {offsets = [0, 0], sizes = [1, 128], strides = [1, 1]} : vector<4x128xf32> to vector<1x128xf32>
    %104 = arith.mulf %12, %102 : vector<1x128xf32>
    %105 = arith.addf %103, %104 : vector<1x128xf32>
    %cst_36 = arith.constant 0.000000e+00 : f32
    %106 = vector.broadcast %cst_36 : f32 to vector<1x128xf32>
    %107 = arith.maximumf %105, %106 : vector<1x128xf32>
    %108 = vector.extract_strided_slice %76 {offsets = [1, 0], sizes = [1, 128], strides = [1, 1]} : vector<4x128xf32> to vector<1x128xf32>
    %109 = arith.mulf %12, %107 : vector<1x128xf32>
    %110 = arith.addf %108, %109 : vector<1x128xf32>
    %cst_37 = arith.constant 0.000000e+00 : f32
    %111 = vector.broadcast %cst_37 : f32 to vector<1x128xf32>
    %112 = arith.maximumf %110, %111 : vector<1x128xf32>
    %113 = vector.extract_strided_slice %76 {offsets = [2, 0], sizes = [1, 128], strides = [1, 1]} : vector<4x128xf32> to vector<1x128xf32>
    %114 = arith.mulf %12, %112 : vector<1x128xf32>
    %115 = arith.addf %113, %114 : vector<1x128xf32>
    %cst_38 = arith.constant 0.000000e+00 : f32
    %116 = vector.broadcast %cst_38 : f32 to vector<1x128xf32>
    %117 = arith.maximumf %115, %116 : vector<1x128xf32>
    %118 = vector.extract_strided_slice %76 {offsets = [3, 0], sizes = [1, 128], strides = [1, 1]} : vector<4x128xf32> to vector<1x128xf32>
    %119 = arith.mulf %12, %117 : vector<1x128xf32>
    %120 = arith.addf %118, %119 : vector<1x128xf32>
    %cst_39 = arith.constant 0.000000e+00 : f32
    %121 = vector.broadcast %cst_39 : f32 to vector<1x128xf32>
    %122 = arith.maximumf %120, %121 : vector<1x128xf32>
    %123 = tpu.concatenate %107, %112, %117, %122 in 0 : vector<1x128xf32>, vector<1x128xf32>, vector<1x128xf32>, vector<1x128xf32> -> vector<4x128xf32>
    %124 = arith.truncf %123 : vector<4x128xf32> to vector<4x128xbf16>
    %c128 = arith.constant 128 : index
    %c0_40 = arith.constant 0 : index
    %125 = vector.load %arg2[%c128, %c0_40] : memref<512x128xbf16, #tpu.memory_space<vmem>>, vector<128x128xbf16>
    %cst_41 = arith.constant dense<0.000000e+00> : vector<4x128xf32>
    %126 = tpu.matmul %124, %125, %cst_41 {dimension_numbers = #tpu.dot_dimension_numbers<[1], [0], [0], [1], [0, 0, 1, 1], [], []>} : vector<4x128xbf16>, vector<128x128xbf16>, vector<4x128xf32> -> vector<4x128xf32>
    %127 = arith.addf %126, %18 : vector<4x128xf32>
    %128 = vector.extract_strided_slice %101 {offsets = [0, 0], sizes = [1, 128], strides = [1, 1]} : vector<4x128xf32> to vector<1x128xf32>
    %129 = arith.mulf %12, %122 : vector<1x128xf32>
    %130 = arith.addf %128, %129 : vector<1x128xf32>
    %cst_42 = arith.constant 0.000000e+00 : f32
    %131 = vector.broadcast %cst_42 : f32 to vector<1x128xf32>
    %132 = arith.maximumf %130, %131 : vector<1x128xf32>
    %133 = vector.extract_strided_slice %101 {offsets = [1, 0], sizes = [1, 128], strides = [1, 1]} : vector<4x128xf32> to vector<1x128xf32>
    %134 = arith.mulf %12, %132 : vector<1x128xf32>
    %135 = arith.addf %133, %134 : vector<1x128xf32>
    %cst_43 = arith.constant 0.000000e+00 : f32
    %136 = vector.broadcast %cst_43 : f32 to vector<1x128xf32>
    %137 = arith.maximumf %135, %136 : vector<1x128xf32>
    %138 = vector.extract_strided_slice %101 {offsets = [2, 0], sizes = [1, 128], strides = [1, 1]} : vector<4x128xf32> to vector<1x128xf32>
    %139 = arith.mulf %12, %137 : vector<1x128xf32>
    %140 = arith.addf %138, %139 : vector<1x128xf32>
    %cst_44 = arith.constant 0.000000e+00 : f32
    %141 = vector.broadcast %cst_44 : f32 to vector<1x128xf32>
    %142 = arith.maximumf %140, %141 : vector<1x128xf32>
    %143 = vector.extract_strided_slice %101 {offsets = [3, 0], sizes = [1, 128], strides = [1, 1]} : vector<4x128xf32> to vector<1x128xf32>
    %144 = arith.mulf %12, %142 : vector<1x128xf32>
    %145 = arith.addf %143, %144 : vector<1x128xf32>
    %cst_45 = arith.constant 0.000000e+00 : f32
    %146 = vector.broadcast %cst_45 : f32 to vector<1x128xf32>
    %147 = arith.maximumf %145, %146 : vector<1x128xf32>
    %148 = tpu.concatenate %132, %137, %142, %147 in 0 : vector<1x128xf32>, vector<1x128xf32>, vector<1x128xf32>, vector<1x128xf32> -> vector<4x128xf32>
    %149 = arith.truncf %148 : vector<4x128xf32> to vector<4x128xbf16>
    %c128_46 = arith.constant 128 : index
    %c0_47 = arith.constant 0 : index
    %150 = vector.load %arg2[%c128_46, %c0_47] : memref<512x128xbf16, #tpu.memory_space<vmem>>, vector<128x128xbf16>
    %cst_48 = arith.constant dense<0.000000e+00> : vector<4x128xf32>
    %151 = tpu.matmul %149, %150, %cst_48 {dimension_numbers = #tpu.dot_dimension_numbers<[1], [0], [0], [1], [0, 0, 1, 1], [], []>} : vector<4x128xbf16>, vector<128x128xbf16>, vector<4x128xf32> -> vector<4x128xf32>
    %152 = arith.addf %151, %18 : vector<4x128xf32>
    %153 = tpu.concatenate %127, %152 in 0 : vector<4x128xf32>, vector<4x128xf32> -> vector<8x128xf32>
    %cst_49 = arith.constant 0.000000e+00 : f32
    %154 = vector.broadcast %cst_49 : f32 to vector<8x128xf32>
    %cst_50 = arith.constant 0.000000e+00 : f32
    %155 = vector.broadcast %cst_50 : f32 to vector<8x128xf32>
    %156 = arith.mulf %25, %154 : vector<8x128xf32>
    %157 = arith.addf %153, %156 : vector<8x128xf32>
    %cst_51 = arith.constant 0.000000e+00 : f32
    %158 = vector.broadcast %cst_51 : f32 to vector<8x128xf32>
    %159 = arith.maximumf %157, %158 : vector<8x128xf32>
    %160 = arith.truncf %159 : vector<8x128xf32> to vector<8x128xbf16>
    %c256 = arith.constant 256 : index
    %c0_52 = arith.constant 0 : index
    %161 = vector.load %arg2[%c256, %c0_52] : memref<512x128xbf16, #tpu.memory_space<vmem>>, vector<128x128xbf16>
    %cst_53 = arith.constant dense<0.000000e+00> : vector<8x128xf32>
    %162 = tpu.matmul %160, %161, %cst_53 {dimension_numbers = #tpu.dot_dimension_numbers<[1], [0], [0], [1], [0, 0, 1, 1], [], []>} : vector<8x128xbf16>, vector<128x128xbf16>, vector<8x128xf32> -> vector<8x128xf32>
    %163 = arith.addf %162, %28 : vector<8x128xf32>
    %164 = arith.mulf %35, %155 : vector<8x128xf32>
    %165 = arith.addf %163, %164 : vector<8x128xf32>
    %cst_54 = arith.constant 0.000000e+00 : f32
    %166 = vector.broadcast %cst_54 : f32 to vector<8x128xf32>
    %167 = arith.maximumf %165, %166 : vector<8x128xf32>
    %168 = arith.truncf %167 : vector<8x128xf32> to vector<8x128xbf16>
    %c384 = arith.constant 384 : index
    %c0_55 = arith.constant 0 : index
    %169 = vector.load %arg2[%c384, %c0_55] : memref<512x128xbf16, #tpu.memory_space<vmem>>, vector<128x128xbf16>
    %cst_56 = arith.constant dense<0.000000e+00> : vector<8x128xf32>
    %170 = tpu.matmul %168, %169, %cst_56 {dimension_numbers = #tpu.dot_dimension_numbers<[1], [0], [0], [1], [0, 0, 1, 1], [], []>} : vector<8x128xbf16>, vector<128x128xbf16>, vector<8x128xf32> -> vector<8x128xf32>
    %171 = arith.addf %170, %38 : vector<8x128xf32>
    %c0_57 = arith.constant 0 : index
    %c0_58 = arith.constant 0 : index
    %172 = vector.load %arg3[%c0_57, %c0_58] : memref<32x128xf32, #tpu.memory_space<vmem>>, vector<8x128xf32>
    tpu.vector_store %arg3[%c0_57, %c0_58], %171 {strides = array<i32>} : memref<32x128xf32, #tpu.memory_space<vmem>>, vector<8x128xf32>,
    %173 = arith.mulf %25, %159 : vector<8x128xf32>
    %174 = arith.addf %153, %173 : vector<8x128xf32>
    %cst_59 = arith.constant 0.000000e+00 : f32
    %175 = vector.broadcast %cst_59 : f32 to vector<8x128xf32>
    %176 = arith.maximumf %174, %175 : vector<8x128xf32>
    %177 = arith.truncf %176 : vector<8x128xf32> to vector<8x128xbf16>
    %c256_60 = arith.constant 256 : index
    %c0_61 = arith.constant 0 : index
    %178 = vector.load %arg2[%c256_60, %c0_61] : memref<512x128xbf16, #tpu.memory_space<vmem>>, vector<128x128xbf16>
    %cst_62 = arith.constant dense<0.000000e+00> : vector<8x128xf32>
    %179 = tpu.matmul %177, %178, %cst_62 {dimension_numbers = #tpu.dot_dimension_numbers<[1], [0], [0], [1], [0, 0, 1, 1], [], []>} : vector<8x128xbf16>, vector<128x128xbf16>, vector<8x128xf32> -> vector<8x128xf32>
    %180 = arith.addf %179, %28 : vector<8x128xf32>
    %181 = arith.mulf %35, %167 : vector<8x128xf32>
    %182 = arith.addf %180, %181 : vector<8x128xf32>
    %cst_63 = arith.constant 0.000000e+00 : f32
    %183 = vector.broadcast %cst_63 : f32 to vector<8x128xf32>
    %184 = arith.maximumf %182, %183 : vector<8x128xf32>
    %185 = arith.truncf %184 : vector<8x128xf32> to vector<8x128xbf16>
    %c384_64 = arith.constant 384 : index
    %c0_65 = arith.constant 0 : index
    %186 = vector.load %arg2[%c384_64, %c0_65] : memref<512x128xbf16, #tpu.memory_space<vmem>>, vector<128x128xbf16>
    %cst_66 = arith.constant dense<0.000000e+00> : vector<8x128xf32>
    %187 = tpu.matmul %185, %186, %cst_66 {dimension_numbers = #tpu.dot_dimension_numbers<[1], [0], [0], [1], [0, 0, 1, 1], [], []>} : vector<8x128xbf16>, vector<128x128xbf16>, vector<8x128xf32> -> vector<8x128xf32>
    %188 = arith.addf %187, %38 : vector<8x128xf32>
    %c8_67 = arith.constant 8 : index
    %c0_68 = arith.constant 0 : index
    %189 = vector.load %arg3[%c8_67, %c0_68] : memref<32x128xf32, #tpu.memory_space<vmem>>, vector<8x128xf32>
    tpu.vector_store %arg3[%c8_67, %c0_68], %188 {strides = array<i32>} : memref<32x128xf32, #tpu.memory_space<vmem>>, vector<8x128xf32>,
    %190 = arith.mulf %25, %176 : vector<8x128xf32>
    %191 = arith.addf %153, %190 : vector<8x128xf32>
    %cst_69 = arith.constant 0.000000e+00 : f32
    %192 = vector.broadcast %cst_69 : f32 to vector<8x128xf32>
    %193 = arith.maximumf %191, %192 : vector<8x128xf32>
    %194 = arith.truncf %193 : vector<8x128xf32> to vector<8x128xbf16>
    %c256_70 = arith.constant 256 : index
    %c0_71 = arith.constant 0 : index
    %195 = vector.load %arg2[%c256_70, %c0_71] : memref<512x128xbf16, #tpu.memory_space<vmem>>, vector<128x128xbf16>
    %cst_72 = arith.constant dense<0.000000e+00> : vector<8x128xf32>
    %196 = tpu.matmul %194, %195, %cst_72 {dimension_numbers = #tpu.dot_dimension_numbers<[1], [0], [0], [1], [0, 0, 1, 1], [], []>} : vector<8x128xbf16>, vector<128x128xbf16>, vector<8x128xf32> -> vector<8x128xf32>
    %197 = arith.addf %196, %28 : vector<8x128xf32>
    %198 = arith.mulf %35, %184 : vector<8x128xf32>
    %199 = arith.addf %197, %198 : vector<8x128xf32>
    %cst_73 = arith.constant 0.000000e+00 : f32
    %200 = vector.broadcast %cst_73 : f32 to vector<8x128xf32>
    %201 = arith.maximumf %199, %200 : vector<8x128xf32>
    %202 = arith.truncf %201 : vector<8x128xf32> to vector<8x128xbf16>
    %c384_74 = arith.constant 384 : index
    %c0_75 = arith.constant 0 : index
    %203 = vector.load %arg2[%c384_74, %c0_75] : memref<512x128xbf16, #tpu.memory_space<vmem>>, vector<128x128xbf16>
    %cst_76 = arith.constant dense<0.000000e+00> : vector<8x128xf32>
    %204 = tpu.matmul %202, %203, %cst_76 {dimension_numbers = #tpu.dot_dimension_numbers<[1], [0], [0], [1], [0, 0, 1, 1], [], []>} : vector<8x128xbf16>, vector<128x128xbf16>, vector<8x128xf32> -> vector<8x128xf32>
    %205 = arith.addf %204, %38 : vector<8x128xf32>
    %c16 = arith.constant 16 : index
    %c0_77 = arith.constant 0 : index
    %206 = vector.load %arg3[%c16, %c0_77] : memref<32x128xf32, #tpu.memory_space<vmem>>, vector<8x128xf32>
    tpu.vector_store %arg3[%c16, %c0_77], %205 {strides = array<i32>} : memref<32x128xf32, #tpu.memory_space<vmem>>, vector<8x128xf32>,
    %207 = arith.mulf %25, %193 : vector<8x128xf32>
    %208 = arith.addf %153, %207 : vector<8x128xf32>
    %cst_78 = arith.constant 0.000000e+00 : f32
    %209 = vector.broadcast %cst_78 : f32 to vector<8x128xf32>
    %210 = arith.maximumf %208, %209 : vector<8x128xf32>
    %211 = arith.truncf %210 : vector<8x128xf32> to vector<8x128xbf16>
    %c256_79 = arith.constant 256 : index
    %c0_80 = arith.constant 0 : index
    %212 = vector.load %arg2[%c256_79, %c0_80] : memref<512x128xbf16, #tpu.memory_space<vmem>>, vector<128x128xbf16>
    %cst_81 = arith.constant dense<0.000000e+00> : vector<8x128xf32>
    %213 = tpu.matmul %211, %212, %cst_81 {dimension_numbers = #tpu.dot_dimension_numbers<[1], [0], [0], [1], [0, 0, 1, 1], [], []>} : vector<8x128xbf16>, vector<128x128xbf16>, vector<8x128xf32> -> vector<8x128xf32>
    %214 = arith.addf %213, %28 : vector<8x128xf32>
    %215 = arith.mulf %35, %201 : vector<8x128xf32>
    %216 = arith.addf %214, %215 : vector<8x128xf32>
    %cst_82 = arith.constant 0.000000e+00 : f32
    %217 = vector.broadcast %cst_82 : f32 to vector<8x128xf32>
    %218 = arith.maximumf %216, %217 : vector<8x128xf32>
    %219 = arith.truncf %218 : vector<8x128xf32> to vector<8x128xbf16>
    %c384_83 = arith.constant 384 : index
    %c0_84 = arith.constant 0 : index
    %220 = vector.load %arg2[%c384_83, %c0_84] : memref<512x128xbf16, #tpu.memory_space<vmem>>, vector<128x128xbf16>
    %cst_85 = arith.constant dense<0.000000e+00> : vector<8x128xf32>
    %221 = tpu.matmul %219, %220, %cst_85 {dimension_numbers = #tpu.dot_dimension_numbers<[1], [0], [0], [1], [0, 0, 1, 1], [], []>} : vector<8x128xbf16>, vector<128x128xbf16>, vector<8x128xf32> -> vector<8x128xf32>
    %222 = arith.addf %221, %38 : vector<8x128xf32>
    %c24 = arith.constant 24 : index
    %c0_86 = arith.constant 0 : index
    %223 = vector.load %arg3[%c24, %c0_86] : memref<32x128xf32, #tpu.memory_space<vmem>>, vector<8x128xf32>
    tpu.vector_store %arg3[%c24, %c0_86], %222 {strides = array<i32>} : memref<32x128xf32, #tpu.memory_space<vmem>>, vector<8x128xf32>,
    return
  }
}

</mosaic_0001>

<bundles_post_ra>
// kernel: tpu_custom_call.1
= control target key start
LH: loop header
LB: loop body
LE: loop exit
PB: predicated region body
PF: predicated region fallthrough
CT: control target
= control target key end

     0   :  { %8 = vsyncpa [#allocation3], 0  ;;  %s2281_s0 = inlined_call_operand.vmem [shape: f32[8,2], index: 0, kind: input, shape index: {}]   ;;  %s2282_s1 = inlined_call_operand.hbm [shape: f32[16,128], index: 1, kind: input, shape index: {}]   ;;  %s2283_s2 = inlined_call_operand.hbm [shape: bf16[512,128], index: 2, kind: input, shape index: {}]   ;;  %s2284_s3 = inlined_call_operand.hbm [shape: f32[32,128], index: 3, kind: output, shape index: {}]  }
   0x1   :  { %9 = vsyncpa [#allocation6], 0 }
   0x2   :  { %10 = vsyncpa [#allocation4], 0  ;;  %s2042_s12 = smov [#allocation2]   ;;  %s1970_s16 = scalar_lea.hbm %s2282_s1, 256 }
   0x3   :  { %s18_s13 = sshll.u32 %s2042_s12, 4  ;;  %p1971_p0 = scmp.ne.s32.totalorder %s2282_s1, %s1970_s16  ;;  %s19_s13 = int_to_ptr.vmem [resolvable:$true] %s18_s13 }
   0x4   :  { %p1974_p1 = scmp.lt.u32.totalorder %s1970_s16, %s2282_s1 }
   0x6   :  { %p1976_p2 = pnand %p1974_p1, %p1971_p0 }
   0x8   :  { %1979 = shalt.err (!%p1976_p2)
}
   0x9   :  { %s1980_s21 = scalar_lea.vmem %s19_s13, 256  ;;  %p1985_p4 = scmp.lt.s32.totalorder %s19_s13, %s19_s13 }
   0xa   :  { %p1981_p3 = scmp.ne.s32.totalorder %s19_s13, %s1980_s21  ;;  %p1986_p5 = scmp.lt.s32.totalorder %s1980_s21, %s1980_s21 }
   0xc   :  { %p1987_p6 = por %p1986_p5, %p1985_p4 }
   0xe   :  { %p1988_p7 = pnand %p1987_p6, %p1981_p3 }
  0x10   :  { %1991 = shalt.err (!%p1988_p7)
}
  0x11   :  { %s2043_s22 = smov 128   ;;  %s2044_s23 = smov 8  }
  0x12   :  { %24 = dma.hbm_to_vmem [thread:$0]  %s2282_s1, 256, %s19_s13, [#allocation3], %s2043_s22, %s2043_s22, %s2044_s23  }
  0x13   :  { %s2045_s26 = smov [#allocation5]   ;;  %s1992_s30 = scalar_lea.hbm %s2283_s2, 4096 }
  0x14   :  { %s30_s27 = sshll.u32 %s2045_s26, 4  ;;  %p1993_p8 = scmp.ne.s32.totalorder %s2283_s2, %s1992_s30  ;;  %s31_s27 = int_to_ptr.vmem [resolvable:$true] %s30_s27 }
  0x15   :  { %p1996_p9 = scmp.lt.u32.totalorder %s1992_s30, %s2283_s2 }
  0x17   :  { %p1998_p10 = pnand %p1996_p9, %p1993_p8 }
  0x19   :  { %2001 = shalt.err (!%p1998_p10)
}
  0x1a   :  { %s2002_s8 = scalar_lea.vmem %s31_s27, 4096  ;;  %p2007_p12 = scmp.lt.s32.totalorder %s31_s27, %s31_s27 }
  0x1b   :  { %p2003_p11 = scmp.ne.s32.totalorder %s31_s27, %s2002_s8  ;;  %p2008_p13 = scmp.lt.s32.totalorder %s2002_s8, %s2002_s8 }
  0x1d   :  { %p2009_p0 = por %p2008_p13, %p2007_p12 }
  0x1f   :  { %p2010_p1 = pnand %p2009_p0, %p2003_p11 }
  0x21   :  { %2013 = shalt.err (!%p2010_p1)
}
  0x22   :  { %s2046_s1 = smov 64   ;;  %s2047_s9 = smov 4  }
  0x23   :  { %36 = dma.hbm_to_vmem [thread:$0]  %s2283_s2, 4096, %s31_s27, [#allocation6], %s2046_s1, %s2046_s1, %s2047_s9  }
  0x24   :  { %2036 = dma.done.wait [#allocation3], 256  }
  0x25   :  { %2037 = vsyncadd [#allocation3], 4294967040 }
  0x26   :  { %2038 = dma.done.wait [#allocation6], 4096  }
  0x27   :  { %2039 = vsyncadd [#allocation6], 4294963200  ;;  %v2048_v0 = vmov 0   ;;  %v87_v1 = vld [vmem:[%s2281_s0] sm:$0xff]  ;;  %v2049_v2 = vmov 1   ;;  %v1890_v3 = vld [vmem:[#allocation5] sm:$0xff]  }
  0x28   :  { %1888 = vset.pattern.permute.xlu0 %v2048_v0  ;;  %v2050_v4 = vmov 0.0   ;;  %vm2051_vm0 = vmmov 0   ;;  %v1891_v5 = vld [vmem:[#allocation5 + $0x8] sm:$0xff]   ;;  %v1892_v6 = vld [vmem:[#allocation5 + $0x10] sm:$0xff]   ;;  %v1893_v7 = vld [vmem:[#allocation5 + $0x18] sm:$0xff]   ;;  %vm140_vm1 = vcmask 1040384  }
  0x29   :  { %90 = vperm.xlu0 %1888, %v87_v1   ;;  %1637 = vmatprep.subr.bf16.mxu0 %v2050_v4  ;;  %v1894_v8 = vld [vmem:[#allocation5 + $0x20] sm:$0xff]   ;;  %v1895_v9 = vld [vmem:[#allocation5 + $0x28] sm:$0xff]   ;;  %v1896_v10 = vld [vmem:[#allocation5 + $0x30] sm:$0xff]   ;;  %vm142_vm2 = vcmask 1041408   ;;  %vm144_vm3 = vcmask 1042432   ;;  %vm550_vm4 = vcmask 1043456  }
  0x2a   :  { %1653 = vmatprep.mubr.msk.bf16.mxu0 %vm2051_vm0, %v2050_v4  ;;  %1638 = vmatpush3.bf16.msra.mxu0 %v1890_v3  ;;  %v1897_v11 = vld [vmem:[#allocation5 + $0x38] sm:$0xff]   ;;  %v47_v13 = vld [vmem:[#allocation2 + $0x3] sm:$0x1]  ;;  %v1446_v14 = vld [vmem:[#allocation2] ss:$0 sm:$0xff]  ;;  %s2052_s0 = smov [#allocation7]  }
  0x2b   :  { %1657 = vmatprep.subr.bf16.mxu1 %v2050_v4  ;;  %1639 = vmatprep.subr.bf16.mxu0 %v2050_v4  ;;  %v1447_v15 = vld [vmem:[#allocation2 + $0x1] ss:$0 sm:$0xff]  ;;  %v1438_v16 = vclamps-f32 %v47_v13, 1.0905077  ;;  %v1448_v20 = vld [vmem:[#allocation2 + $0x2] ss:$0 sm:$0xff] }
  0x2c   :  { %1658 = vmatpush3.bf16.msra.mxu1 %v1890_v3  ;;  %1673 = vmatprep.mubr.msk.bf16.mxu1 %vm2051_vm0, %v2050_v4  ;;  %v1903_v13 = vld [vmem:[#allocation5 + $0x68] sm:$0xff]   ;;  %s1425_s2 = sshll.u32 %s2052_s0, 4  ;;  %s1426_s2 = int_to_ptr.vmem [resolvable:$true] %s1425_s2 }
  0x2d   :  { %1889 = vset.pattern.permute.xlu0 %v2049_v2  ;;  %1659 = vmatprep.subr.bf16.mxu1 %v2050_v4  ;;  %v113_v22 = vmul.f32 0.0, %v1438_v16  ;;  %s2014_s14 = scalar_lea.vmem %s1426_s2, 512  ;;  %p2019_p3 = scmp.lt.s32.totalorder %s1426_s2, %s1426_s2 }
  0x2e   :  { %99 = vperm.xlu0 %1889, %v87_v1   ;;  %1640 = vmatpush3.bf16.msra.mxu0 %v1891_v5  ;;  %p2015_p2 = scmp.ne.s32.totalorder %s1426_s2, %s2014_s14  ;;  %p2020_p4 = scmp.lt.s32.totalorder %s2014_s14, %s2014_s14 }
  0x2f   :  { %1641 = vmatprep.subr.bf16.mxu0 %v2050_v4 }
  0x30   :  { %1660 = vmatpush3.bf16.msra.mxu1 %v1891_v5  ;;  %p2021_p5 = por %p2020_p4, %p2019_p3 }
  0x31   :  { %1661 = vmatprep.subr.bf16.mxu1 %v2050_v4 }
  0x32   :  { %1642 = vmatpush3.bf16.msra.mxu0 %v1892_v6  ;;  %p2022_p6 = pnand %p2021_p5, %p2015_p2 }
  0x33   :  { %1643 = vmatprep.subr.bf16.mxu0 %v2050_v4 }
  0x34   :  { %1662 = vmatpush3.bf16.msra.mxu1 %v1892_v6 }
  0x35   :  { %1663 = vmatprep.subr.bf16.mxu1 %v2050_v4 }
  0x36   :  { %1644 = vmatpush3.bf16.msra.mxu0 %v1893_v7 }
  0x37   :  { %1645 = vmatprep.subr.bf16.mxu0 %v2050_v4 }
  0x38   :  { %1664 = vmatpush3.bf16.msra.mxu1 %v1893_v7 }
  0x39   :  { %1665 = vmatprep.subr.bf16.mxu1 %v2050_v4 }
  0x3a   :  { %1646 = vmatpush3.bf16.msra.mxu0 %v1894_v8 }
  0x3b   :  { %1647 = vmatprep.subr.bf16.mxu0 %v2050_v4 }
  0x3c   :  { %1666 = vmatpush3.bf16.msra.mxu1 %v1894_v8  ;;  %v1898_v8 = vld [vmem:[#allocation5 + $0x40] sm:$0xff]  }
  0x3d   :  { %1667 = vmatprep.subr.bf16.mxu1 %v2050_v4 }
  0x3e   :  { %1648 = vmatpush3.bf16.msra.mxu0 %v1895_v9 }
  0x3f   :  { %1649 = vmatprep.subr.bf16.mxu0 %v2050_v4 }
  0x40   :  { %1668 = vmatpush3.bf16.msra.mxu1 %v1895_v9  ;;  %v1899_v9 = vld [vmem:[#allocation5 + $0x48] sm:$0xff]  }
  0x41   :  { %1669 = vmatprep.subr.bf16.mxu1 %v2050_v4 }
  0x42   :  { %1650 = vmatpush3.bf16.msra.mxu0 %v1896_v10 }
  0x43   :  { %1651 = vmatprep.subr.bf16.mxu0 %v2050_v4 }
  0x44   :  { %1670 = vmatpush3.bf16.msra.mxu1 %v1896_v10  ;;  %v1900_v10 = vld [vmem:[#allocation5 + $0x50] sm:$0xff]  }
  0x45   :  { %1671 = vmatprep.subr.bf16.mxu1 %v2050_v4 }
  0x46   :  { %1652 = vmatpush3.bf16.msra.mxu0 %v1897_v11 }
  0x47   :  { %1677 = vmatprep.subr.bf16.mxu0 %v2050_v4 }
  0x48   :  { %1672 = vmatpush3.bf16.msra.mxu1 %v1897_v11  ;;  %v1901_v11 = vld [vmem:[#allocation5 + $0x58] sm:$0xff]  }
  0x49   :  { %1697 = vmatprep.subr.bf16.mxu1 %v2050_v4 }
  0xa8   :  { %v91_v12 = vpop.permute.xlu0 %90 }
  0xa9   :  { %v97_v18 = vmul.f32 %v1446_v14, %v91_v12  ;;  %v1902_v12 = vld [vmem:[#allocation5 + $0x60] sm:$0xff]   ;;  %v1904_v14 = vld [vmem:[#allocation5 + $0x70] sm:$0xff]  }
  0xad   :  { %v100_v17 = vpop.permute.xlu0 %99 }
  0xae   :  { %v106_v19 = vmul.f32 %v1447_v15, %v100_v17  ;;  %v1905_v15 = vld [vmem:[#allocation5 + $0x78] sm:$0xff]  }
  0xb0   :  { %v107_v21 = vadd.f32 %v106_v19, %v97_v18  ;;  %v1440_v18 = vld [vmem:[#allocation2 + $0x4] ss:$0 sm:$0xff] }
  0xb2   :  { %v112_v23 = vadd.f32 %v1448_v20, %v107_v21 }
  0xb4   :  { %v114_v24 = vadd.f32 %v113_v22, %v112_v23 }
  0xb6   :  { %v115_v25 = vmax.f32 %v114_v24, 0.0 }
  0xb8   :  { %v116_v26 = vmul.f32 %v1438_v16, %v115_v25 }
  0xba   :  { %v118_v27 = vrot.slane %v116_v26, 7 }
  0xbc   :  { %v120_v28 = vadd.f32 %v118_v27, %v112_v23 }
  0xbe   :  { %v121_v29 = vmax.f32 %v120_v28, 0.0 }
  0xc0   :  { %v123_v30 = vrot.slane %v121_v29, 1  ;;  %v141_v40 = vsel %vm140_vm1, %v115_v25, %v121_v29 }
  0xc2   :  { %v125_v31 = vmul.f32 %v1438_v16, %v123_v30 }
  0xc4   :  { %v127_v32 = vrot.slane %v125_v31, 6 }
  0xc6   :  { %v129_v33 = vadd.f32 %v127_v32, %v112_v23 }
  0xc8   :  { %v130_v34 = vmax.f32 %v129_v33, 0.0 }
  0xca   :  { %v132_v35 = vrot.slane %v130_v34, 2  ;;  %v143_v41 = vsel %vm142_vm2, %v141_v40, %v130_v34 }
  0xcc   :  { %v134_v36 = vmul.f32 %v1438_v16, %v132_v35 }
  0xce   :  { %v136_v37 = vrot.slane %v134_v36, 5 }
  0xd0   :  { %v138_v38 = vadd.f32 %v136_v37, %v112_v23 }
  0xd2   :  { %v139_v39 = vmax.f32 %v138_v38, 0.0 }
  0xd4   :  { %v145_v42 = vsel %vm144_vm3, %v143_v41, %v139_v39  ;;  %v252_v43 = vrot.slane %v139_v39, 3 }
  0xd5   :  { %v146_v44 = vpack.c.bf16 %v145_v42, %v145_v42 }
  0xd6   :  { %v254_v45 = vmul.f32 %v1438_v16, %v252_v43 }
  0xd7   :  { %1654 = vmatmul.mubr.bf16.vlgmr.msra.gmra.mrb[0].mxu0 %v146_v44 }
  0xd8   :  { %v256_v46 = vrot.slane %v254_v45, 4  ;;  %1693 = vmatprep.mubr.msk.bf16.mxu0 %vm2051_vm0, %v2050_v4  ;;  %1678 = vmatpush3.bf16.msra.mxu0 %v1898_v8 }
  0xd9   :  { %1679 = vmatprep.subr.bf16.mxu0 %v2050_v4 }
  0xda   :  { %v258_v47 = vadd.f32 %v256_v46, %v112_v23 }
  0xdc   :  { %v259_v48 = vmax.f32 %v258_v47, 0.0  ;;  %1680 = vmatpush3.bf16.msra.mxu0 %v1899_v9 }
  0xdd   :  { %1681 = vmatprep.subr.bf16.mxu0 %v2050_v4 }
  0xde   :  { %v261_v49 = vrot.slane %v259_v48, 4 }
  0xe0   :  { %v263_v50 = vmul.f32 %v1438_v16, %v261_v49  ;;  %1682 = vmatpush3.bf16.msra.mxu0 %v1900_v10 }
  0xe1   :  { %1683 = vmatprep.subr.bf16.mxu0 %v2050_v4 }
  0xe2   :  { %v265_v51 = vrot.slane %v263_v50, 3 }
  0xe4   :  { %v267_v52 = vadd.f32 %v265_v51, %v112_v23  ;;  %1684 = vmatpush3.bf16.msra.mxu0 %v1901_v11 }
  0xe5   :  { %1685 = vmatprep.subr.bf16.mxu0 %v2050_v4 }
  0xe6   :  { %v268_v53 = vmax.f32 %v267_v52, 0.0 }
  0xe8   :  { %v270_v54 = vrot.slane %v268_v53, 5  ;;  %v287_v63 = vrot.slane %v268_v53, 4  ;;  %1686 = vmatpush3.bf16.msra.mxu0 %v1902_v12 }
  0xe9   :  { %1687 = vmatprep.subr.bf16.mxu0 %v2050_v4 }
  0xea   :  { %v272_v55 = vmul.f32 %v1438_v16, %v270_v54  ;;  %v294_v3 = vsel %vm140_vm1, %v261_v49, %v287_v63 }
  0xec   :  { %v274_v56 = vrot.slane %v272_v55, 2  ;;  %1688 = vmatpush3.bf16.msra.mxu0 %v1903_v13 }
  0xed   :  { %1689 = vmatprep.subr.bf16.mxu0 %v2050_v4 }
  0xee   :  { %v276_v57 = vadd.f32 %v274_v56, %v112_v23 }
  0xf0   :  { %v277_v58 = vmax.f32 %v276_v57, 0.0  ;;  %1690 = vmatpush3.bf16.msra.mxu0 %v1904_v14 }
  0xf1   :  { %1691 = vmatprep.subr.bf16.mxu0 %v2050_v4 }
  0xf2   :  { %v279_v59 = vrot.slane %v277_v58, 6  ;;  %v289_v0 = vrot.slane %v277_v58, 4 }
  0xf4   :  { %v281_v60 = vmul.f32 %v1438_v16, %v279_v59  ;;  %v295_v5 = vsel %vm142_vm2, %v294_v3, %v289_v0  ;;  %1692 = vmatpush3.bf16.msra.mxu0 %v1905_v15  ;;  %v50_v16 = vld [vmem:[#allocation2 + $0x5] sm:$0x1] }
  0xf5   :  { %1717 = vmatprep.subr.bf16.mxu0 %v2050_v4  ;;  %v1439_v17 = vclamps-f32 %v50_v16, 1.0905077  ;;  %v1913_v16 = vld [vmem:[#allocation5 + $0xb8] sm:$0xff]  }
  0xf6   :  { %v283_v61 = vrot.slane %v281_v60, 1 }
  0xf7   :  { %v338_v19 = vmul.f32 0.0, %v1439_v17 }
  0xf8   :  { %v285_v62 = vadd.f32 %v283_v61, %v112_v23 }
  0xfa   :  { %v286_v1 = vmax.f32 %v285_v62, 0.0 }
  0xfc   :  { %v292_v2 = vrot.slane %v286_v1, 4 }
  0xfe   :  { %v296_v6 = vsel %vm144_vm3, %v295_v5, %v292_v2 }
  0xff   :  { %v297_v7 = vpack.c.bf16 %v296_v6, %v296_v6 }
 0x101   :  { %1674 = vmatmul.mubr.bf16.vlgmr.msra.gmra.mrb[0].mxu1 %v297_v7 }
 0x102   :  { %1713 = vmatprep.mubr.msk.bf16.mxu1 %vm2051_vm0, %v2050_v4  ;;  %1698 = vmatpush3.bf16.msra.mxu1 %v1898_v8 }
 0x103   :  { %1699 = vmatprep.subr.bf16.mxu1 %v2050_v4 }
 0x106   :  { %1700 = vmatpush3.bf16.msra.mxu1 %v1899_v9  ;;  %v1906_v9 = vld [vmem:[#allocation5 + $0x80] sm:$0xff]  }
 0x107   :  { %1701 = vmatprep.subr.bf16.mxu1 %v2050_v4 }
 0x10a   :  { %1702 = vmatpush3.bf16.msra.mxu1 %v1900_v10  ;;  %v1907_v10 = vld [vmem:[#allocation5 + $0x88] sm:$0xff]  }
 0x10b   :  { %1703 = vmatprep.subr.bf16.mxu1 %v2050_v4 }
 0x10e   :  { %1704 = vmatpush3.bf16.msra.mxu1 %v1901_v11  ;;  %v1908_v11 = vld [vmem:[#allocation5 + $0x90] sm:$0xff]  }
 0x10f   :  { %1705 = vmatprep.subr.bf16.mxu1 %v2050_v4 }
 0x112   :  { %1706 = vmatpush3.bf16.msra.mxu1 %v1902_v12  ;;  %v1909_v12 = vld [vmem:[#allocation5 + $0x98] sm:$0xff]  }
 0x113   :  { %1707 = vmatprep.subr.bf16.mxu1 %v2050_v4 }
 0x116   :  { %1708 = vmatpush3.bf16.msra.mxu1 %v1903_v13  ;;  %v1910_v13 = vld [vmem:[#allocation5 + $0xa0] sm:$0xff]  }
 0x117   :  { %1709 = vmatprep.subr.bf16.mxu1 %v2050_v4 }
 0x11a   :  { %1710 = vmatpush3.bf16.msra.mxu1 %v1904_v14  ;;  %v1911_v14 = vld [vmem:[#allocation5 + $0xa8] sm:$0xff]  }
 0x11b   :  { %1711 = vmatprep.subr.bf16.mxu1 %v2050_v4 }
 0x11e   :  { %1712 = vmatpush3.bf16.msra.mxu1 %v1905_v15  ;;  %v1912_v15 = vld [vmem:[#allocation5 + $0xb0] sm:$0xff]  }
 0x11f   :  { %1737 = vmatprep.subr.bf16.mxu1 %v2050_v4 }
 0x1aa   :  { %v245_v20 = vpop.f32.mrb[0].mxu0 }
 0x1ab   :  { %v246_v21 = vadd.f32 %v1440_v18, %v245_v20  ;;  %v1655_v22 = vpop.f32.mrb[1].mxu0 }
 0x1ac   :  { %v248_v23 = vpop.f32.mrb[2].mxu0  ;;  %v1939_v22 = vld [vmem:[#allocation5 + $0xc8] sm:$0xff]  }
 0x1ad   :  { %v339_v24 = vadd.f32 %v338_v19, %v246_v21  ;;  %v1656_v25 = vpop.f32.mrb[3].mxu0  ;;  %v66_v23 = vlaneseq }
 0x1af   :  { %v340_v26 = vmax.f32 %v339_v24, 0.0  ;;  %v1940_v24 = vld [vmem:[#allocation5 + $0xd0] sm:$0xff]   ;;  %v2171_v25 = vshrl.u32 %v66_v23, 7 }
 0x1b1   :  { %v341_v27 = vmul.f32 %v1439_v17, %v340_v26 }
 0x1b3   :  { %v343_v28 = vrot.slane %v341_v27, 7  ;;  %v63_v27 = vld [vmem:[#allocation2 + $0x7] sm:$0x1] }
 0x1b5   :  { %v345_v29 = vadd.f32 %v343_v28, %v246_v21  ;;  %v1442_v28 = vclamps-f32 %v63_v27, 1.1892071 }
 0x1b7   :  { %v346_v30 = vmax.f32 %v345_v29, 0.0  ;;  %v68_v29 = vsub.s32 0, %v2171_v25  ;;  %v1948_v25 = vld [vmem:[#allocation5 + $0xd0] sm:$0xff]  }
 0x1b9   :  { %v348_v31 = vrot.slane %v346_v30, 1  ;;  %v365_v41 = vsel %vm140_vm1, %v340_v26, %v346_v30  ;;  %v1941_v26 = vld [vmem:[#allocation5 + $0xd8] sm:$0xff]   ;;  %v1942_v30 = vld [vmem:[#allocation5 + $0xe0] sm:$0xff]  }
 0x1bb   :  { %v350_v32 = vmul.f32 %v1439_v17, %v348_v31  ;;  %v2178_v31 = vrot.slane %v1442_v28, %v68_v29 }
 0x1bd   :  { %v352_v33 = vrot.slane %v350_v32, 6  ;;  %v1943_v32 = vld [vmem:[#allocation5 + $0xe8] sm:$0xff]  }
 0x1bf   :  { %v354_v34 = vadd.f32 %v352_v33, %v246_v21  ;;  %v1441_v33 = vld [vmem:[#allocation2 + $0x6] ss:$0 sm:$0xff] }
 0x1c1   :  { %v355_v35 = vmax.f32 %v354_v34, 0.0 }
 0x1c3   :  { %v357_v36 = vrot.slane %v355_v35, 2  ;;  %v366_v42 = vsel %vm142_vm2, %v365_v41, %v355_v35 }
 0x1c5   :  { %v359_v37 = vmul.f32 %v1439_v17, %v357_v36 }
 0x1c7   :  { %v361_v38 = vrot.slane %v359_v37, 5  ;;  %v552_v37 = vmul.f32 0.0, %v2178_v31 }
 0x1c9   :  { %v363_v39 = vadd.f32 %v361_v38, %v246_v21  ;;  %v1938_v21 = vld [vmem:[#allocation5 + $0xc0] sm:$0xff]  }
 0x1cb   :  { %v364_v40 = vmax.f32 %v363_v39, 0.0 }
 0x1cd   :  { %v367_v43 = vsel %vm144_vm3, %v366_v42, %v364_v40  ;;  %v474_v45 = vrot.slane %v364_v40, 3 }
 0x1ce   :  { %v368_v44 = vpack.c.bf16 %v367_v43, %v367_v43 }
 0x1cf   :  { %v476_v48 = vmul.f32 %v1439_v17, %v474_v45  ;;  %v1914_v45 = vld [vmem:[#allocation5 + $0x80] sm:$0xff]  }
 0x1d0   :  { %1694 = vmatmul.mubr.bf16.vlgmr.msra.gmra.mrb[4].mxu0 %v368_v44 }
 0x1d1   :  { %1733 = vmatprep.mubr.msk.bf16.mxu0 %vm2051_vm0, %v2050_v4  ;;  %1718 = vmatpush3.bf16.msra.mxu0 %v1906_v9  ;;  %v1932_v9 = vld [vmem:[#allocation5 + $0x90] sm:$0xff]  }
 0x1d2   :  { %1719 = vmatprep.subr.bf16.mxu0 %v2050_v4 }
 0x1d4   :  { %v332_v46 = vpop.f32.mrb[0].mxu1 }
 0x1d5   :  { %v333_v47 = vadd.f32 %v1440_v18, %v332_v46  ;;  %v1675_v49 = vpop.f32.mrb[1].mxu1  ;;  %1720 = vmatpush3.bf16.msra.mxu0 %v1907_v10  ;;  %v1933_v10 = vld [vmem:[#allocation5 + $0x98] sm:$0xff]  }
 0x1d6   :  { %v335_v50 = vpop.f32.mrb[2].mxu1  ;;  %1721 = vmatprep.subr.bf16.mxu0 %v2050_v4  ;;  %v1917_v49 = vld [vmem:[#allocation5 + $0x98] sm:$0xff]  }
 0x1d7   :  { %v477_v51 = vadd.f32 %v476_v48, %v333_v47  ;;  %v1676_v52 = vpop.f32.mrb[3].mxu1  ;;  %v1916_v48 = vld [vmem:[#allocation5 + $0x90] sm:$0xff]   ;;  %v1918_v50 = vld [vmem:[#allocation5 + $0xa0] sm:$0xff]  }
 0x1d9   :  { %v478_v53 = vmax.f32 %v477_v51, 0.0  ;;  %1722 = vmatpush3.bf16.msra.mxu0 %v1908_v11  ;;  %v1919_v51 = vld [vmem:[#allocation5 + $0xa8] sm:$0xff]   ;;  %v1934_v11 = vld [vmem:[#allocation5 + $0xa0] sm:$0xff]  }
 0x1da   :  { %1723 = vmatprep.subr.bf16.mxu0 %v2050_v4 }
 0x1db   :  { %v479_v54 = vmul.f32 %v1439_v17, %v478_v53 }
 0x1dd   :  { %v481_v55 = vrot.slane %v479_v54, 7  ;;  %1724 = vmatpush3.bf16.msra.mxu0 %v1909_v12  ;;  %v1935_v12 = vld [vmem:[#allocation5 + $0xa8] sm:$0xff]  }
 0x1de   :  { %1725 = vmatprep.subr.bf16.mxu0 %v2050_v4 }
 0x1df   :  { %v483_v56 = vadd.f32 %v481_v55, %v333_v47  ;;  %v1921_v55 = vld [vmem:[#allocation5 + $0xb8] sm:$0xff]  }
 0x1e1   :  { %v484_v57 = vmax.f32 %v483_v56, 0.0  ;;  %1726 = vmatpush3.bf16.msra.mxu0 %v1910_v13 }
 0x1e2   :  { %1727 = vmatprep.subr.bf16.mxu0 %v2050_v4 }
 0x1e3   :  { %v486_v58 = vrot.slane %v484_v57, 1  ;;  %v503_v59 = vsel %vm140_vm1, %v478_v53, %v484_v57  ;;  %v1920_v53 = vld [vmem:[#allocation5 + $0xb0] sm:$0xff]   ;;  %v1922_v57 = vld [vmem:[#allocation5 + $0x80] sm:$0xff]  }
 0x1e5   :  { %v488_v60 = vmul.f32 %v1439_v17, %v486_v58  ;;  %1728 = vmatpush3.bf16.msra.mxu0 %v1911_v14  ;;  %v1944_v14 = vld [vmem:[#allocation5 + $0xf0] sm:$0xff]  }
 0x1e6   :  { %1729 = vmatprep.subr.bf16.mxu0 %v2050_v4 }
 0x1e7   :  { %v490_v61 = vrot.slane %v488_v60, 6  ;;  %v1924_v60 = vld [vmem:[#allocation5 + $0x90] sm:$0xff]  }
 0x1e9   :  { %v492_v62 = vadd.f32 %v490_v61, %v333_v47  ;;  %1730 = vmatpush3.bf16.msra.mxu0 %v1912_v15  ;;  %v1925_v61 = vld [vmem:[#allocation5 + $0x98] sm:$0xff]   ;;  %v1936_v15 = vld [vmem:[#allocation5 + $0xb0] sm:$0xff]  }
 0x1ea   :  { %1731 = vmatprep.subr.bf16.mxu0 %v2050_v4 }
 0x1eb   :  { %v493_v63 = vmax.f32 %v492_v62, 0.0  ;;  %v1926_v62 = vld [vmem:[#allocation5 + $0xa0] sm:$0xff]  }
 0x1ed   :  { %v495_v0 = vrot.slane %v493_v63, 2  ;;  %v504_v1 = vsel %vm142_vm2, %v503_v59, %v493_v63  ;;  %1732 = vmatpush3.bf16.msra.mxu0 %v1913_v16  ;;  %v1923_v59 = vld [vmem:[#allocation5 + $0x88] sm:$0xff]  }
 0x1ee   :  { %1757 = vmatprep.subr.bf16.mxu0 %v2050_v4  ;;  %v1927_v63 = vld [vmem:[#allocation5 + $0xa8] sm:$0xff]  }
 0x1ef   :  { %v497_v2 = vmul.f32 %v1439_v17, %v495_v0 }
 0x1f1   :  { %v499_v3 = vrot.slane %v497_v2, 5 }
 0x1f3   :  { %v501_v5 = vadd.f32 %v499_v3, %v333_v47  ;;  %v1915_v47 = vld [vmem:[#allocation5 + $0x88] sm:$0xff]   ;;  %v1929_v3 = vld [vmem:[#allocation5 + $0xb8] sm:$0xff]  }
 0x1f5   :  { %v502_v6 = vmax.f32 %v501_v5, 0.0 }
 0x1f7   :  { %v505_v7 = vsel %vm144_vm3, %v504_v1, %v502_v6  ;;  %v1928_v1 = vld [vmem:[#allocation5 + $0xb0] sm:$0xff]   ;;  %v1930_v6 = vld [vmem:[#allocation5 + $0x80] sm:$0xff]  }
 0x1f8   :  { %v506_v8 = vpack.c.bf16 %v505_v7, %v505_v7 }
 0x1fa   :  { %1714 = vmatmul.mubr.bf16.vlgmr.msra.gmra.mrb[4].mxu1 %v506_v8  ;;  %v1931_v8 = vld [vmem:[#allocation5 + $0x88] sm:$0xff]  }
 0x1fb   :  { %1753 = vmatprep.mubr.msk.bf16.mxu1 %vm2051_vm0, %v2050_v4  ;;  %1738 = vmatpush3.bf16.msra.mxu1 %v1938_v21  ;;  %v75_v21 = vld [vmem:[#allocation2 + $0x9] sm:$0x1] }
 0x1fc   :  { %1739 = vmatprep.subr.bf16.mxu1 %v2050_v4 }
 0x1ff   :  { %1740 = vmatpush3.bf16.msra.mxu1 %v1939_v22  ;;  %v1444_v22 = vclamps-f32 %v75_v21, 1.1892071 }
 0x200   :  { %1741 = vmatprep.subr.bf16.mxu1 %v2050_v4 }
 0x201   :  { %v2225_v23 = vrot.slane %v1444_v22, %v68_v29  ;;  %v1949_v29 = vld [vmem:[#allocation5 + $0xd8] sm:$0xff]  }
 0x202   :  { %v1445_v22 = vld [vmem:[#allocation2 + $0xa] ss:$0 sm:$0xff] }
 0x203   :  { %1742 = vmatpush3.bf16.msra.mxu1 %v1940_v24  ;;  %v2227_v24 = vld [vmem:[#allocation2 + $0x8] ss:$0 sm:$0xff] }
 0x204   :  { %1743 = vmatprep.subr.bf16.mxu1 %v2050_v4 }
 0x207   :  { %1744 = vmatpush3.bf16.msra.mxu1 %v1941_v26  ;;  %v660_v26 = vmul.f32 0.0, %v2225_v23 }
 0x208   :  { %1745 = vmatprep.subr.bf16.mxu1 %v2050_v4 }
 0x20b   :  { %1746 = vmatpush3.bf16.msra.mxu1 %v1942_v30 }
 0x20c   :  { %1747 = vmatprep.subr.bf16.mxu1 %v2050_v4 }
 0x20f   :  { %1748 = vmatpush3.bf16.msra.mxu1 %v1943_v32 }
 0x210   :  { %1749 = vmatprep.subr.bf16.mxu1 %v2050_v4 }
 0x213   :  { %1750 = vmatpush3.bf16.msra.mxu1 %v1944_v14 }
 0x214   :  { %1751 = vmatprep.subr.bf16.mxu1 %v2050_v4 }
 0x2a3   :  { %v467_v17 = vpop.f32.mrb[4].mxu0 }
 0x2a4   :  { %v1695_v18 = vpop.f32.mrb[5].mxu0  ;;  %v468_v39 = vadd.f32 %v1441_v33, %v467_v17  ;;  %v1945_v17 = vld [vmem:[#allocation5 + $0xf8] sm:$0xff]  }
 0x2a5   :  { %v470_v19 = vpop.f32.mrb[6].mxu0  ;;  %v1937_v18 = vld [vmem:[#allocation5 + $0xb8] sm:$0xff]   ;;  %1752 = vmatpush3.bf16.msra.mxu1 %v1945_v17 }
 0x2a6   :  { %v1696_v20 = vpop.f32.mrb[7].mxu0  ;;  %1777 = vmatprep.subr.bf16.mxu1 %v2050_v4  ;;  %v1969_v17 = vld [vmem:[#allocation5 + $0xf8] sm:$0xff]  }
 0x2cd   :  { %v541_v34 = vpop.f32.mrb[4].mxu1 }
 0x2ce   :  { %v542_v35 = vadd.f32 %v1441_v33, %v541_v34  ;;  %v1715_v36 = vpop.f32.mrb[5].mxu1 }
 0x2cf   :  { %v544_v38 = vpop.f32.mrb[6].mxu1 }
 0x2d0   :  { %v548_v40 = vrot.slane %v542_v35, 4  ;;  %v1716_v41 = vpop.f32.mrb[7].mxu1  ;;  %v1946_v35 = vld [vmem:[#allocation5 + $0xc0] sm:$0xff]  }
 0x2d1   :  { %v1950_v38 = vld [vmem:[#allocation5 + $0xe0] sm:$0xff]  }
 0x2d2   :  { %v2183_v42 = vsel %vm550_vm4, %v468_v39, %v548_v40  ;;  %v1951_v39 = vld [vmem:[#allocation5 + $0xe8] sm:$0xff]   ;;  %v1952_v40 = vld [vmem:[#allocation5 + $0xf0] sm:$0xff]  }
 0x2d3   :  { %v553_v43 = vadd.f32 %v552_v37, %v2183_v42  ;;  %v1947_v37 = vld [vmem:[#allocation5 + $0xc8] sm:$0xff]  }
 0x2d5   :  { %v554_v44 = vmax.f32 %v553_v43, 0.0 }
 0x2d7   :  { %v555_v46 = vpack.c.bf16 %v554_v44, %v554_v44  ;;  %v769_v52 = vmul.f32 %v554_v44, %v2178_v31 }
 0x2d9   :  { %1734 = vmatmul.mubr.bf16.vlgmr.msra.gmra.mrb[8].mxu0 %v555_v46  ;;  %v770_v54 = vadd.f32 %v769_v52, %v2183_v42  ;;  %v1953_v46 = vld [vmem:[#allocation5 + $0xf8] sm:$0xff]   ;;  %v1955_v52 = vld [vmem:[#allocation5 + $0xc8] sm:$0xff]  }
 0x2da   :  { %1758 = vmatpush3.bf16.msra.mxu0 %v1914_v45  ;;  %1773 = vmatprep.mubr.msk.bf16.mxu0 %vm2051_vm0, %v2050_v4 }
 0x2db   :  { %1759 = vmatprep.subr.bf16.mxu0 %v2050_v4  ;;  %v771_v56 = vmax.f32 %v770_v54, 0.0  ;;  %v1957_v54 = vld [vmem:[#allocation5 + $0xd8] sm:$0xff]  }
 0x2dd   :  { %v772_v58 = vpack.c.bf16 %v771_v56, %v771_v56  ;;  %v986_v0 = vmul.f32 %v771_v56, %v2178_v31  ;;  %v1959_v56 = vld [vmem:[#allocation5 + $0xe8] sm:$0xff]  }
 0x2de   :  { %1760 = vmatpush3.bf16.msra.mxu0 %v1915_v47 }
 0x2df   :  { %1761 = vmatprep.subr.bf16.mxu0 %v2050_v4  ;;  %v987_v2 = vadd.f32 %v986_v0, %v2183_v42 }
 0x2e1   :  { %v988_v5 = vmax.f32 %v987_v2, 0.0 }
 0x2e2   :  { %1762 = vmatpush3.bf16.msra.mxu0 %v1916_v48 }
 0x2e3   :  { %1763 = vmatprep.subr.bf16.mxu0 %v2050_v4  ;;  %v989_v7 = vpack.c.bf16 %v988_v5, %v988_v5  ;;  %v1203_v13 = vmul.f32 %v988_v5, %v2178_v31 }
 0x2e5   :  { %v1204_v16 = vadd.f32 %v1203_v13, %v2183_v42 }
 0x2e6   :  { %1764 = vmatpush3.bf16.msra.mxu0 %v1917_v49 }
 0x2e7   :  { %1765 = vmatprep.subr.bf16.mxu0 %v2050_v4  ;;  %v1205_v19 = vmax.f32 %v1204_v16, 0.0 }
 0x2e9   :  { %v1206_v20 = vpack.c.bf16 %v1205_v19, %v1205_v19 }
 0x2ea   :  { %1766 = vmatpush3.bf16.msra.mxu0 %v1918_v50  ;;  %v1954_v50 = vld [vmem:[#allocation5 + $0xc0] sm:$0xff]  }
 0x2eb   :  { %1767 = vmatprep.subr.bf16.mxu0 %v2050_v4 }
 0x2ee   :  { %1768 = vmatpush3.bf16.msra.mxu0 %v1919_v51 }
 0x2ef   :  { %1769 = vmatprep.subr.bf16.mxu0 %v2050_v4 }
 0x2f2   :  { %1770 = vmatpush3.bf16.msra.mxu0 %v1920_v53  ;;  %v1956_v53 = vld [vmem:[#allocation5 + $0xd0] sm:$0xff]  }
 0x2f3   :  { %1771 = vmatprep.subr.bf16.mxu0 %v2050_v4 }
 0x2f6   :  { %1772 = vmatpush3.bf16.msra.mxu0 %v1921_v55  ;;  %v1958_v55 = vld [vmem:[#allocation5 + $0xe0] sm:$0xff]  }
 0x2f7   :  { %1797 = vmatprep.subr.bf16.mxu0 %v2050_v4 }
 0x2f9   :  { %1774 = vmatmul.mubr.bf16.vlgmr.msra.gmra.mrb[12].mxu0 %v772_v58 }
 0x2fa   :  { %1798 = vmatpush3.bf16.msra.mxu0 %v1922_v57  ;;  %1813 = vmatprep.mubr.msk.bf16.mxu0 %vm2051_vm0, %v2050_v4  ;;  %v1960_v57 = vld [vmem:[#allocation5 + $0xf0] sm:$0xff]  }
 0x2fb   :  { %1799 = vmatprep.subr.bf16.mxu0 %v2050_v4 }
 0x2fe   :  { %1800 = vmatpush3.bf16.msra.mxu0 %v1923_v59 }
 0x2ff   :  { %1801 = vmatprep.subr.bf16.mxu0 %v2050_v4 }
 0x302   :  { %1802 = vmatpush3.bf16.msra.mxu0 %v1924_v60 }
 0x303   :  { %1803 = vmatprep.subr.bf16.mxu0 %v2050_v4 }
 0x306   :  { %1804 = vmatpush3.bf16.msra.mxu0 %v1925_v61 }
 0x307   :  { %1805 = vmatprep.subr.bf16.mxu0 %v2050_v4 }
 0x30a   :  { %1806 = vmatpush3.bf16.msra.mxu0 %v1926_v62 }
 0x30b   :  { %1807 = vmatprep.subr.bf16.mxu0 %v2050_v4 }
 0x30e   :  { %1808 = vmatpush3.bf16.msra.mxu0 %v1927_v63  ;;  %v1961_v63 = vld [vmem:[#allocation5 + $0xf8] sm:$0xff]  }
 0x30f   :  { %1809 = vmatprep.subr.bf16.mxu0 %v2050_v4 }
 0x312   :  { %1810 = vmatpush3.bf16.msra.mxu0 %v1928_v1 }
 0x313   :  { %1811 = vmatprep.subr.bf16.mxu0 %v2050_v4 }
 0x316   :  { %1812 = vmatpush3.bf16.msra.mxu0 %v1929_v3  ;;  %v1962_v3 = vld [vmem:[#allocation5 + $0xc0] sm:$0xff]  }
 0x317   :  { %1837 = vmatprep.subr.bf16.mxu0 %v2050_v4 }
 0x319   :  { %1814 = vmatmul.mubr.bf16.vlgmr.msra.gmra.mrb[16].mxu0 %v989_v7  ;;  %v1964_v7 = vld [vmem:[#allocation5 + $0xd0] sm:$0xff]  }
 0x31a   :  { %1838 = vmatpush3.bf16.msra.mxu0 %v1930_v6  ;;  %1853 = vmatprep.mubr.msk.bf16.mxu0 %vm2051_vm0, %v2050_v4  ;;  %v1963_v6 = vld [vmem:[#allocation5 + $0xc8] sm:$0xff]  }
 0x31b   :  { %1839 = vmatprep.subr.bf16.mxu0 %v2050_v4 }
 0x31e   :  { %1840 = vmatpush3.bf16.msra.mxu0 %v1931_v8  ;;  %v1965_v8 = vld [vmem:[#allocation5 + $0xd8] sm:$0xff]  }
 0x31f   :  { %1841 = vmatprep.subr.bf16.mxu0 %v2050_v4 }
 0x322   :  { %1842 = vmatpush3.bf16.msra.mxu0 %v1932_v9  ;;  %v1966_v9 = vld [vmem:[#allocation5 + $0xe0] sm:$0xff]  }
 0x323   :  { %1843 = vmatprep.subr.bf16.mxu0 %v2050_v4 }
 0x326   :  { %1844 = vmatpush3.bf16.msra.mxu0 %v1933_v10  ;;  %v1967_v10 = vld [vmem:[#allocation5 + $0xe8] sm:$0xff]  }
 0x327   :  { %1845 = vmatprep.subr.bf16.mxu0 %v2050_v4 }
 0x32a   :  { %1846 = vmatpush3.bf16.msra.mxu0 %v1934_v11  ;;  %v1968_v11 = vld [vmem:[#allocation5 + $0xf0] sm:$0xff]  }
 0x32b   :  { %1847 = vmatprep.subr.bf16.mxu0 %v2050_v4 }
 0x32e   :  { %1848 = vmatpush3.bf16.msra.mxu0 %v1935_v12 }
 0x32f   :  { %1849 = vmatprep.subr.bf16.mxu0 %v2050_v4 }
 0x332   :  { %1850 = vmatpush3.bf16.msra.mxu0 %v1936_v15 }
 0x333   :  { %1851 = vmatprep.subr.bf16.mxu0 %v2050_v4 }
 0x336   :  { %1852 = vmatpush3.bf16.msra.mxu0 %v1937_v18 }
 0x339   :  { %1854 = vmatmul.mubr.bf16.vlgmr.msra.gmra.mrb[20].mxu0 %v1206_v20 }
 0x3ac   :  { %v654_v27 = vpop.f32.mrb[8].mxu0 }
 0x3ad   :  { %v655_v28 = vadd.f32 %v2227_v24, %v654_v27  ;;  %v1735_v30 = vpop.f32.mrb[9].mxu0 }
 0x3ae   :  { %v657_v31 = vpop.f32.mrb[10].mxu0 }
 0x3af   :  { %v661_v32 = vadd.f32 %v660_v26, %v655_v28  ;;  %v1736_v33 = vpop.f32.mrb[11].mxu0 }
 0x3b1   :  { %v662_v34 = vmax.f32 %v661_v32, 0.0 }
 0x3b3   :  { %v663_v36 = vpack.c.bf16 %v662_v34, %v662_v34  ;;  %v877_v43 = vmul.f32 %v662_v34, %v2225_v23 }
 0x3b5   :  { %1754 = vmatmul.mubr.bf16.vlgmr.msra.gmra.mrb[8].mxu1 %v663_v36 }
 0x3b6   :  { %1778 = vmatpush3.bf16.msra.mxu1 %v1946_v35  ;;  %1793 = vmatprep.mubr.msk.bf16.mxu1 %vm2051_vm0, %v2050_v4 }
 0x3b7   :  { %1779 = vmatprep.subr.bf16.mxu1 %v2050_v4 }
 0x3ba   :  { %1780 = vmatpush3.bf16.msra.mxu1 %v1947_v37 }
 0x3bb   :  { %1781 = vmatprep.subr.bf16.mxu1 %v2050_v4 }
 0x3be   :  { %1782 = vmatpush3.bf16.msra.mxu1 %v1948_v25 }
 0x3bf   :  { %1783 = vmatprep.subr.bf16.mxu1 %v2050_v4 }
 0x3c2   :  { %1784 = vmatpush3.bf16.msra.mxu1 %v1949_v29 }
 0x3c3   :  { %1785 = vmatprep.subr.bf16.mxu1 %v2050_v4 }
 0x3c6   :  { %1786 = vmatpush3.bf16.msra.mxu1 %v1950_v38 }
 0x3c7   :  { %1787 = vmatprep.subr.bf16.mxu1 %v2050_v4 }
 0x3ca   :  { %1788 = vmatpush3.bf16.msra.mxu1 %v1951_v39 }
 0x3cb   :  { %1789 = vmatprep.subr.bf16.mxu1 %v2050_v4 }
 0x3cc   :  { %v871_v41 = vpop.f32.mrb[12].mxu0 }
 0x3cd   :  { %v872_v42 = vadd.f32 %v2227_v24, %v871_v41  ;;  %v1775_v44 = vpop.f32.mrb[13].mxu0 }
 0x3ce   :  { %v874_v45 = vpop.f32.mrb[14].mxu0  ;;  %1790 = vmatpush3.bf16.msra.mxu1 %v1952_v40 }
 0x3cf   :  { %v878_v47 = vadd.f32 %v877_v43, %v872_v42  ;;  %v1776_v48 = vpop.f32.mrb[15].mxu0  ;;  %1791 = vmatprep.subr.bf16.mxu1 %v2050_v4 }
 0x3d1   :  { %v879_v49 = vmax.f32 %v878_v47, 0.0 }
 0x3d2   :  { %1792 = vmatpush3.bf16.msra.mxu1 %v1953_v46 }
 0x3d3   :  { %v880_v51 = vpack.c.bf16 %v879_v49, %v879_v49  ;;  %1817 = vmatprep.subr.bf16.mxu1 %v2050_v4  ;;  %v1094_v60 = vmul.f32 %v879_v49, %v2225_v23 }
 0x3d5   :  { %1794 = vmatmul.mubr.bf16.vlgmr.msra.gmra.mrb[12].mxu1 %v880_v51 }
 0x3d6   :  { %1818 = vmatpush3.bf16.msra.mxu1 %v1954_v50  ;;  %1833 = vmatprep.mubr.msk.bf16.mxu1 %vm2051_vm0, %v2050_v4 }
 0x3d7   :  { %1819 = vmatprep.subr.bf16.mxu1 %v2050_v4 }
 0x3da   :  { %1820 = vmatpush3.bf16.msra.mxu1 %v1955_v52 }
 0x3db   :  { %1821 = vmatprep.subr.bf16.mxu1 %v2050_v4 }
 0x3de   :  { %1822 = vmatpush3.bf16.msra.mxu1 %v1956_v53 }
 0x3df   :  { %1823 = vmatprep.subr.bf16.mxu1 %v2050_v4 }
 0x3e2   :  { %1824 = vmatpush3.bf16.msra.mxu1 %v1957_v54 }
 0x3e3   :  { %1825 = vmatprep.subr.bf16.mxu1 %v2050_v4 }
 0x3e6   :  { %1826 = vmatpush3.bf16.msra.mxu1 %v1958_v55 }
 0x3e7   :  { %1827 = vmatprep.subr.bf16.mxu1 %v2050_v4 }
 0x3ea   :  { %1828 = vmatpush3.bf16.msra.mxu1 %v1959_v56 }
 0x3eb   :  { %1829 = vmatprep.subr.bf16.mxu1 %v2050_v4 }
 0x3ec   :  { %v1088_v58 = vpop.f32.mrb[16].mxu0 }
 0x3ed   :  { %v1089_v59 = vadd.f32 %v2227_v24, %v1088_v58  ;;  %v1815_v61 = vpop.f32.mrb[17].mxu0 }
 0x3ee   :  { %v1091_v62 = vpop.f32.mrb[18].mxu0  ;;  %1830 = vmatpush3.bf16.msra.mxu1 %v1960_v57 }
 0x3ef   :  { %v1095_v0 = vadd.f32 %v1094_v60, %v1089_v59  ;;  %v1816_v1 = vpop.f32.mrb[19].mxu0  ;;  %1831 = vmatprep.subr.bf16.mxu1 %v2050_v4 }
 0x3f1   :  { %v1096_v2 = vmax.f32 %v1095_v0, 0.0 }
 0x3f2   :  { %1832 = vmatpush3.bf16.msra.mxu1 %v1961_v63 }
 0x3f3   :  { %v1097_v5 = vpack.c.bf16 %v1096_v2, %v1096_v2  ;;  %1857 = vmatprep.subr.bf16.mxu1 %v2050_v4  ;;  %v1311_v14 = vmul.f32 %v1096_v2, %v2225_v23 }
 0x3f5   :  { %1834 = vmatmul.mubr.bf16.vlgmr.msra.gmra.mrb[16].mxu1 %v1097_v5 }
 0x3f6   :  { %1858 = vmatpush3.bf16.msra.mxu1 %v1962_v3  ;;  %1873 = vmatprep.mubr.msk.bf16.mxu1 %vm2051_vm0, %v2050_v4 }
 0x3f7   :  { %1859 = vmatprep.subr.bf16.mxu1 %v2050_v4 }
 0x3fa   :  { %1860 = vmatpush3.bf16.msra.mxu1 %v1963_v6 }
 0x3fb   :  { %1861 = vmatprep.subr.bf16.mxu1 %v2050_v4 }
 0x3fe   :  { %1862 = vmatpush3.bf16.msra.mxu1 %v1964_v7 }
 0x3ff   :  { %1863 = vmatprep.subr.bf16.mxu1 %v2050_v4 }
 0x402   :  { %1864 = vmatpush3.bf16.msra.mxu1 %v1965_v8 }
 0x403   :  { %1865 = vmatprep.subr.bf16.mxu1 %v2050_v4 }
 0x406   :  { %1866 = vmatpush3.bf16.msra.mxu1 %v1966_v9 }
 0x407   :  { %1867 = vmatprep.subr.bf16.mxu1 %v2050_v4 }
 0x40a   :  { %1868 = vmatpush3.bf16.msra.mxu1 %v1967_v10 }
 0x40b   :  { %1869 = vmatprep.subr.bf16.mxu1 %v2050_v4 }
 0x40c   :  { %v1305_v12 = vpop.f32.mrb[20].mxu0 }
 0x40d   :  { %v1306_v13 = vadd.f32 %v2227_v24, %v1305_v12  ;;  %v1855_v15 = vpop.f32.mrb[21].mxu0 }
 0x40e   :  { %v1308_v16 = vpop.f32.mrb[22].mxu0  ;;  %1870 = vmatpush3.bf16.msra.mxu1 %v1968_v11 }
 0x40f   :  { %v1312_v18 = vadd.f32 %v1311_v14, %v1306_v13  ;;  %v1856_v19 = vpop.f32.mrb[23].mxu0  ;;  %1871 = vmatprep.subr.bf16.mxu1 %v2050_v4 }
 0x411   :  { %v1313_v20 = vmax.f32 %v1312_v18, 0.0 }
 0x412   :  { %1872 = vmatpush3.bf16.msra.mxu1 %v1969_v17 }
 0x413   :  { %v1314_v21 = vpack.c.bf16 %v1313_v20, %v1313_v20 }
 0x415   :  { %1874 = vmatmul.mubr.bf16.vlgmr.msra.gmra.mrb[20].mxu1 %v1314_v21 }
 0x488   :  { %v762_v26 = vpop.f32.mrb[8].mxu1 }
 0x489   :  { %v763_v27 = vadd.f32 %v1445_v22, %v762_v26  ;;  %v1755_v28 = vpop.f32.mrb[9].mxu1 }
 0x48a   :  { %v765_v30 = vpop.f32.mrb[10].mxu1 }
 0x48b   :  { %768 = vst [vmem:[#allocation7] sm:$0xff] %v763_v27  ;;  %v1756_v24 = vpop.f32.mrb[11].mxu1 }
 0x4a8   :  { %v979_v23 = vpop.f32.mrb[12].mxu1 }
 0x4a9   :  { %v980_v31 = vadd.f32 %v1445_v22, %v979_v23  ;;  %v1795_v32 = vpop.f32.mrb[13].mxu1 }
 0x4aa   :  { %v982_v33 = vpop.f32.mrb[14].mxu1 }
 0x4ab   :  { %985 = vst [vmem:[#allocation7 + $0x8] sm:$0xff] %v980_v31  ;;  %v1796_v34 = vpop.f32.mrb[15].mxu1 }
 0x4c8   :  { %v1196_v35 = vpop.f32.mrb[16].mxu1 }
 0x4c9   :  { %v1197_v36 = vadd.f32 %v1445_v22, %v1196_v35  ;;  %v1835_v4 = vpop.f32.mrb[17].mxu1 }
 0x4ca   :  { %v1199_v37 = vpop.f32.mrb[18].mxu1 }
 0x4cb   :  { %1202 = vst [vmem:[#allocation7 + $0x10] sm:$0xff] %v1197_v36  ;;  %v1836_v25 = vpop.f32.mrb[19].mxu1 }
 0x4e8   :  { %v1413_v29 = vpop.f32.mrb[20].mxu1 }
 0x4e9   :  { %v1414_v38 = vadd.f32 %v1445_v22, %v1413_v29  ;;  %v1875_v39 = vpop.f32.mrb[21].mxu1 }
 0x4ea   :  { %v1416_v40 = vpop.f32.mrb[22].mxu1 }
 0x4eb   :  { %1419 = vst [vmem:[#allocation7 + $0x18] sm:$0xff] %v1414_v38  ;;  %v1876_v41 = vpop.f32.mrb[23].mxu1 }
 0x4ec   :  { %2025 = shalt.err (!%p2022_p6)
}
 0x4ed   :  { %s2026_s17 = scalar_lea.hbm %s2284_s3, 512 }
 0x4ee   :  { %p2027_p7 = scmp.ne.s32.totalorder %s2284_s3, %s2026_s17  ;;  %p2030_p8 = scmp.lt.u32.totalorder %s2026_s17, %s2284_s3 }
 0x4f0   :  { %p2032_p9 = pnand %p2030_p8, %p2027_p7 }
 0x4f2   :  { %2035 = shalt.err (!%p2032_p9)
}
 0x4f3   :  { %1431 = dma.vmem_to_hbm [thread:$0]  %s1426_s2, 512, %s2284_s3, [#allocation4], %s2043_s22, %s2043_s22, %s2044_s23  }
 0x4f4   :  { %2040 = dma.done.wait [#allocation4], 512  }
 0x4f5   :  { %2041 = vsyncadd [#allocation4], 4294966784 }
 0x4f6   :  { %1435 = vsyncpa [#allocation3], 1 }
 0x4f7   :  { %1436 = vsyncpa [#allocation6], 1 }
 0x4f8   :  { %1437 = vsyncpa [#allocation4], 1 }

</bundles_post_ra>
